<compile_context>
chip_gen: v6e
topology: v6e:2x2x1
jax: 0.10.0
libtpu: 0.0.40
codegen_flags: <defaults>
</compile_context>

<pallas_src>
import functools
import math

import jax
import jax.numpy as jnp
from jax.experimental import pallas as pl
from jax.experimental.pallas import tpu as pltpu

_LANE = 128              # lane width (last-dim alignment)
_SUBLANE_BF16 = 16       # sublane packing for bf16 (second-to-last-dim alignment)
_VMEM_BUDGET_BYTES = 48 * (1 << 20)   # conservative vs v7x 64 MiB per-TC physical VMEM


def _round_up(n, m):
    return ((n + m - 1) // m) * m


def _cdiv(a, b):
    return -(-a // b)


def _pad_feature(d):
    # v6e/v7x MXU is 256x256: pad to 256 once the true dim can fill it; tiny dims stay
    # at 128 (lane multiple) since extra padding there is pure waste.
    return _round_up(d, 256) if d >= 192 else _round_up(d, _LANE)


def _mlp_fused_kernel(*refs, n_layers):
    # refs = (x_ref, w0_ref, b0_ref, w1_ref, b1_ref, ..., o_ref)
    # x_ref : [TB, D0_pad]          bf16 batch tile
    # wi_ref: [Di_pad, D(i+1)_pad]  bf16, pre-transposed, VMEM-resident (Buffered(1))
    # bi_ref: [1, D(i+1)_pad]       f32 (f32 epilogue)
    x_ref = refs[0]
    o_ref = refs[-1]
    wb = refs[1:-1]

    h = x_ref[...]                                     # bf16
    for i in range(n_layers):                          # unrolled at trace time
        w = wb[2 * i][...]                             # bf16
        b = wb[2 * i + 1][...]                         # f32
        # bf16 x bf16 on the MXU, f32 accumulation, f32 bias/ReLU epilogue.
        z = jnp.dot(h, w, preferred_element_type=jnp.float32) + b
        if i < n_layers - 1:
            h = jnp.maximum(z, 0.0).astype(jnp.bfloat16)   # ReLU between layers only
        else:
            o_ref[...] = z.astype(o_ref.dtype)


def init_mlp_params(sizes, key):
    """Xavier-uniform weights stored as [out, in] (nn.Linear layout), zero bias."""
    params = []
    for i in range(len(sizes) - 1):
        fan_in, fan_out = sizes[i], sizes[i + 1]
        std = math.sqrt(2.0 / (fan_in + fan_out))
        a = math.sqrt(3.0) * std
        key, wk = jax.random.split(key)
        w = jax.random.uniform(wk, (fan_out, fan_in), jnp.float32, -a, a)
        b = jnp.zeros((fan_out,), jnp.float32)
        params.append((w, b))
    return params


def prepare_params(params):
    """One-time prep: transpose each weight to [in, out], zero-pad feature dims
    (128, or 256 for dims >= 192), and store weights in bf16 (biases stay f32 for
    the f32 epilogue). Zero padding is exact: padded columns stay 0 through
    ReLU/matmul; 0.0 is exactly representable in bf16."""
    prepped = []
    for w, b in params:
        d_out, d_in = w.shape
        d_in_p = _pad_feature(d_in)
        d_out_p = _pad_feature(d_out)
        w_t = (jnp.zeros((d_in_p, d_out_p), jnp.float32)
               .at[:d_in, :d_out].set(w.T)).astype(jnp.bfloat16)
        b_p = jnp.zeros((1, d_out_p), jnp.float32).at[0, :d_out].set(b)
        prepped.append((w_t, b_p))
    return prepped


@functools.partial(jax.jit, static_argnames=("out_dim", "batch_tile"))
def mlp_forward(x, prepped, *, out_dim, batch_tile=2048):
    """Equivalent of MLP.forward(x, t, flag=False), fused into one Pallas kernel."""
    n_layers = len(prepped)
    B, D_in = x.shape
    d_in_p = prepped[0][0].shape[0]
    d_out_p = prepped[-1][0].shape[1]
    widths_p = [d_in_p] + [w.shape[1] for w, _ in prepped]

    # Resident (single-buffered) weight/bias footprint in bytes.
    weight_bytes = sum(w.size * w.dtype.itemsize + b.size * b.dtype.itemsize
                       for w, b in prepped)

    # --- Batch tiling: balanced tiles (minimize pad rows), bf16 sublane (16) aligned,
    # and >=2 grid steps when B is big enough so v7x's two TensorCores both get work.
    min_tiles = 2 if B >= 2 * _SUBLANE_BF16 else 1
    n_tiles = max(_cdiv(B, batch_tile), min_tiles)
    tb = _round_up(_cdiv(B, n_tiles), _SUBLANE_BF16)

    def vmem_est(tb_):
        act = 2 * tb_ * (d_in_p + d_out_p) * 2        # double-buffered bf16 in/out tiles
        inter = 3 * tb_ * max(widths_p) * 4           # live f32 intermediates (estimate)
        return weight_bytes + act + inter             # weights single-buffered

    # Shrink the batch tile if the VMEM estimate overflows the conservative budget.
    while vmem_est(tb) > _VMEM_BUDGET_BYTES and tb > _SUBLANE_BF16:
        tb = max(_SUBLANE_BF16, _round_up(tb // 2, _SUBLANE_BF16))
    n_tiles = _cdiv(B, tb)
    B_p = n_tiles * tb
    vmem_limit = int(min(_VMEM_BUDGET_BYTES, max(32 << 20, vmem_est(tb) + (4 << 20))))

    # Zero-pad the input once, in bf16 (rows -> tile multiple, cols -> padded width).
    x_p = (jnp.zeros((B_p, d_in_p), jnp.bfloat16)
           .at[:B, :D_in].set(x.astype(jnp.bfloat16)))

    flat_params = []
    in_specs = [pl.BlockSpec((tb, d_in_p), lambda i: (i, 0))]   # pipelined activation tile
    for w_t, b_p in prepped:
        flat_params += [w_t, b_p]
        # Full-extent blocks, constant index_map, single-buffered: DMA'd once and kept
        # VMEM-resident across all batch tiles without double-buffer VMEM waste.
        in_specs += [
            pl.BlockSpec(w_t.shape, lambda i: (0, 0), pipeline_mode=pl.Buffered(1)),
            pl.BlockSpec(b_p.shape, lambda i: (0, 0), pipeline_mode=pl.Buffered(1)),
        ]

    # Advisory cost estimate so XLA overlaps this custom call with surrounding HLO.
    flops = 2 * B_p * sum(w.shape[0] * w.shape[1] for w, _ in prepped)
    bytes_accessed = x_p.size * 2 + B_p * d_out_p * 2 + weight_bytes
    cost = pl.CostEstimate(flops=flops, transcendentals=0, bytes_accessed=bytes_accessed)

    kernel = functools.partial(_mlp_fused_kernel, n_layers=n_layers)
    out_p = pl.pallas_call(
        kernel,
        out_shape=jax.ShapeDtypeStruct((B_p, d_out_p), jnp.bfloat16),
        grid=(B_p // tb,),
        in_specs=in_specs,
        out_specs=pl.BlockSpec((tb, d_out_p), lambda i: (i, 0)),
        compiler_params=pltpu.CompilerParams(
            # Batch grid is embarrassingly parallel -> shards across TCs on v7x.
            dimension_semantics=("parallel",),
            vmem_limit_bytes=vmem_limit,
        ),
        cost_estimate=cost,
    )(x_p, *flat_params)

    # Slice padded rows/lanes back to the true output shape; return f32 like the module.
    return out_p[:B, :out_dim].astype(jnp.float32)


if __name__ == "__main__":
    # Small, deterministic example consistent with MLP(sizes=[32, 64, 32, 10]).
    sizes = [32, 64, 32, 10]
    batch = 8

    key = jax.random.PRNGKey(0)
    key, xk = jax.random.split(key)
    x = jax.random.normal(xk, (batch, sizes[0]), jnp.float32)

    params = init_mlp_params(sizes, key)      # nn.Linear layout: [out, in], f32
    prepped = prepare_params(params)          # one-time transpose + padding + bf16 cast

    out = mlp_forward(x, prepped, out_dim=sizes[-1])
    out = jax.block_until_ready(out)

    # Reference check in plain JAX f32 (same math as the PyTorch forward, flag=False).
    # bf16 MXU operands with f32 accumulation -> loosened tolerance vs the f32 reference.
    ref = x
    for i, (w, b) in enumerate(params):
        ref = ref @ w.T + b
        if i < len(params) - 1:
            ref = jnp.maximum(ref, 0.0)

    assert out.shape == (batch, sizes[-1])
    assert jnp.allclose(out, ref, atol=5e-2, rtol=5e-2), float(jnp.max(jnp.abs(out - ref)))

    print("KERNEL_OK")
</pallas_src>

<mosaic_0001>
module attributes {stable_mosaic.version = 11 : i64} {
  func.func @_mlp_fused_kernel(%arg0: i32, %arg1: memref<16x128xbf16, #tpu.memory_space<vmem>>, %arg2: memref<128x128xbf16, #tpu.memory_space<vmem>>, %arg3: memref<1x128xf32, #tpu.memory_space<vmem>>, %arg4: memref<128x128xbf16, #tpu.memory_space<vmem>>, %arg5: memref<1x128xf32, #tpu.memory_space<vmem>>, %arg6: memref<128x128xbf16, #tpu.memory_space<vmem>>, %arg7: memref<1x128xf32, #tpu.memory_space<vmem>>, %arg8: memref<16x128xbf16, #tpu.memory_space<vmem>>) attributes {dimension_semantics = [#tpu.dimension_semantics<parallel>], iteration_bounds = array<i64: 1>, scalar_prefetch = 0 : i64, scratch_operands = 0 : i64, tpu.core_type = #tpu.core_type<tc>, window_params = [{transform_indices = @transform_0, window_bounds = array<i64: 16, 128>}, {pipeline_mode = #tpu.pipeline_mode<synchronous>, transform_indices = @transform_1, window_bounds = array<i64: 128, 128>}, {pipeline_mode = #tpu.pipeline_mode<synchronous>, transform_indices = @transform_2, window_bounds = array<i64: 1, 128>}, {pipeline_mode = #tpu.pipeline_mode<synchronous>, transform_indices = @transform_3, window_bounds = array<i64: 128, 128>}, {pipeline_mode = #tpu.pipeline_mode<synchronous>, transform_indices = @transform_4, window_bounds = array<i64: 1, 128>}, {pipeline_mode = #tpu.pipeline_mode<synchronous>, transform_indices = @transform_5, window_bounds = array<i64: 128, 128>}, {pipeline_mode = #tpu.pipeline_mode<synchronous>, transform_indices = @transform_6, window_bounds = array<i64: 1, 128>}, {transform_indices = @transform_7, window_bounds = array<i64: 16, 128>}]} {
    %c0 = arith.constant 0 : index
    %c0_0 = arith.constant 0 : index
    %0 = vector.load %arg1[%c0, %c0_0] : memref<16x128xbf16, #tpu.memory_space<vmem>>, vector<16x128xbf16>
    %c0_1 = arith.constant 0 : index
    %c0_2 = arith.constant 0 : index
    %1 = vector.load %arg2[%c0_1, %c0_2] : memref<128x128xbf16, #tpu.memory_space<vmem>>, vector<128x128xbf16>
    %c0_3 = arith.constant 0 : index
    %c0_4 = arith.constant 0 : index
    %2 = vector.load %arg3[%c0_3, %c0_4] : memref<1x128xf32, #tpu.memory_space<vmem>>, vector<1x128xf32>
    %cst = arith.constant dense<0.000000e+00> : vector<16x128xf32>
    %3 = tpu.matmul %0, %1, %cst {dimension_numbers = #tpu.dot_dimension_numbers<[1], [0], [0], [1], [0, 0, 1, 1], [], []>} : vector<16x128xbf16>, vector<128x128xbf16>, vector<16x128xf32> -> vector<16x128xf32>
    %4 = vector.broadcast %2 : vector<1x128xf32> to vector<16x128xf32>
    %5 = arith.addf %3, %4 : vector<16x128xf32>
    %cst_5 = arith.constant 0.000000e+00 : f32
    %6 = vector.broadcast %cst_5 : f32 to vector<16x128xf32>
    %7 = arith.maximumf %5, %6 : vector<16x128xf32>
    %8 = arith.truncf %7 : vector<16x128xf32> to vector<16x128xbf16>
    %c0_6 = arith.constant 0 : index
    %c0_7 = arith.constant 0 : index
    %9 = vector.load %arg4[%c0_6, %c0_7] : memref<128x128xbf16, #tpu.memory_space<vmem>>, vector<128x128xbf16>
    %c0_8 = arith.constant 0 : index
    %c0_9 = arith.constant 0 : index
    %10 = vector.load %arg5[%c0_8, %c0_9] : memref<1x128xf32, #tpu.memory_space<vmem>>, vector<1x128xf32>
    %cst_10 = arith.constant dense<0.000000e+00> : vector<16x128xf32>
    %11 = tpu.matmul %8, %9, %cst_10 {dimension_numbers = #tpu.dot_dimension_numbers<[1], [0], [0], [1], [0, 0, 1, 1], [], []>} : vector<16x128xbf16>, vector<128x128xbf16>, vector<16x128xf32> -> vector<16x128xf32>
    %12 = vector.broadcast %10 : vector<1x128xf32> to vector<16x128xf32>
    %13 = arith.addf %11, %12 : vector<16x128xf32>
    %cst_11 = arith.constant 0.000000e+00 : f32
    %14 = vector.broadcast %cst_11 : f32 to vector<16x128xf32>
    %15 = arith.maximumf %13, %14 : vector<16x128xf32>
    %16 = arith.truncf %15 : vector<16x128xf32> to vector<16x128xbf16>
    %c0_12 = arith.constant 0 : index
    %c0_13 = arith.constant 0 : index
    %17 = vector.load %arg6[%c0_12, %c0_13] : memref<128x128xbf16, #tpu.memory_space<vmem>>, vector<128x128xbf16>
    %c0_14 = arith.constant 0 : index
    %c0_15 = arith.constant 0 : index
    %18 = vector.load %arg7[%c0_14, %c0_15] : memref<1x128xf32, #tpu.memory_space<vmem>>, vector<1x128xf32>
    %cst_16 = arith.constant dense<0.000000e+00> : vector<16x128xf32>
    %19 = tpu.matmul %16, %17, %cst_16 {dimension_numbers = #tpu.dot_dimension_numbers<[1], [0], [0], [1], [0, 0, 1, 1], [], []>} : vector<16x128xbf16>, vector<128x128xbf16>, vector<16x128xf32> -> vector<16x128xf32>
    %20 = vector.broadcast %18 : vector<1x128xf32> to vector<16x128xf32>
    %21 = arith.addf %19, %20 : vector<16x128xf32>
    %22 = arith.truncf %21 : vector<16x128xf32> to vector<16x128xbf16>
    %c0_17 = arith.constant 0 : index
    %c0_18 = arith.constant 0 : index
    %23 = vector.load %arg8[%c0_17, %c0_18] : memref<16x128xbf16, #tpu.memory_space<vmem>>, vector<16x128xbf16>
    tpu.vector_store %arg8[%c0_17, %c0_18], %22 {strides = array<i32>} : memref<16x128xbf16, #tpu.memory_space<vmem>>, vector<16x128xbf16>,
    return
  }
  func.func @transform_0(%arg0: i32) -> (i32, i32) {
    %c0_i32 = arith.constant 0 : i32
    %c0_i32_0 = arith.constant 0 : i32
    return %arg0, %c0_i32 : i32, i32
  }
  func.func @transform_1(%arg0: i32) -> (i32, i32) {
    %c0_i32 = arith.constant 0 : i32
    %c0_i32_0 = arith.constant 0 : i32
    %c0_i32_1 = arith.constant 0 : i32
    return %c0_i32, %c0_i32_0 : i32, i32
  }
  func.func @transform_2(%arg0: i32) -> (i32, i32) {
    %c0_i32 = arith.constant 0 : i32
    %c0_i32_0 = arith.constant 0 : i32
    %c0_i32_1 = arith.constant 0 : i32
    return %c0_i32, %c0_i32_0 : i32, i32
  }
  func.func @transform_3(%arg0: i32) -> (i32, i32) {
    %c0_i32 = arith.constant 0 : i32
    %c0_i32_0 = arith.constant 0 : i32
    %c0_i32_1 = arith.constant 0 : i32
    return %c0_i32, %c0_i32_0 : i32, i32
  }
  func.func @transform_4(%arg0: i32) -> (i32, i32) {
    %c0_i32 = arith.constant 0 : i32
    %c0_i32_0 = arith.constant 0 : i32
    %c0_i32_1 = arith.constant 0 : i32
    return %c0_i32, %c0_i32_0 : i32, i32
  }
  func.func @transform_5(%arg0: i32) -> (i32, i32) {
    %c0_i32 = arith.constant 0 : i32
    %c0_i32_0 = arith.constant 0 : i32
    %c0_i32_1 = arith.constant 0 : i32
    return %c0_i32, %c0_i32_0 : i32, i32
  }
  func.func @transform_6(%arg0: i32) -> (i32, i32) {
    %c0_i32 = arith.constant 0 : i32
    %c0_i32_0 = arith.constant 0 : i32
    %c0_i32_1 = arith.constant 0 : i32
    return %c0_i32, %c0_i32_0 : i32, i32
  }
  func.func @transform_7(%arg0: i32) -> (i32, i32) {
    %c0_i32 = arith.constant 0 : i32
    %c0_i32_0 = arith.constant 0 : i32
    return %arg0, %c0_i32 : i32, i32
  }
}

</mosaic_0001>

<bundles_post_ra>
// kernel: mlp_forward.1
= control target key start
LH: loop header
LB: loop body
LE: loop exit
PB: predicated region body
PF: predicated region fallthrough
CT: control target
= control target key end

     0   :  { %12 = vsyncpa [#allocation3], 0  ;;  %s755_s0 = inlined_call_operand.vmem [shape: bf16[16,128], index: 0, kind: input, shape index: {}]   ;;  %s756_s1 = inlined_call_operand.hbm [shape: bf16[128,128], index: 1, kind: input, shape index: {}]   ;;  %s757_s2 = inlined_call_operand.vmem [shape: f32[1,128], index: 2, kind: input, shape index: {}]   ;;  %s758_s3 = inlined_call_operand.hbm [shape: bf16[128,128], index: 3, kind: input, shape index: {}]   ;;  %s759_s4 = inlined_call_operand.vmem [shape: f32[1,128], index: 4, kind: input, shape index: {}]   ;;  %s760_s5 = inlined_call_operand.hbm [shape: bf16[128,128], index: 5, kind: input, shape index: {}]   ;;  %s761_s6 = inlined_call_operand.vmem [shape: f32[1,128], index: 6, kind: input, shape index: {}]   ;;  %s762_s7 = inlined_call_operand.vmem [shape: bf16[16,128], index: 7, kind: output, shape index: {}]  }
   0x1   :  { %13 = vsyncpa [#allocation5], 0  ;;  %s654_s24 = smov [#allocation4]   ;;  %s655_s26 = smov [#allocation2]  }
   0x2   :  { %s35_s25 = sshll.u32 %s654_s24, 4  ;;  %s21_s27 = sshll.u32 %s655_s26, 4  ;;  %s36_s25 = int_to_ptr.vmem [resolvable:$true] %s35_s25  ;;  %s22_s27 = int_to_ptr.vmem [resolvable:$true] %s21_s27 }
   0x3   :  { %s598_s28 = scalar_lea.vmem %s36_s25, 1024  ;;  %p603_p1 = scmp.lt.s32.totalorder %s36_s25, %s36_s25 }
   0x4   :  { %p599_p0 = scmp.ne.s32.totalorder %s36_s25, %s598_s28  ;;  %p604_p2 = scmp.lt.s32.totalorder %s598_s28, %s598_s28 }
   0x6   :  { %p605_p3 = por %p604_p2, %p603_p1 }
   0x8   :  { %p606_p4 = pnand %p605_p3, %p599_p0 }
   0xa   :  { %609 = shalt.err (!%p606_p4)
}
   0xb   :  { %s656_s29 = smov 64   ;;  %s657_s30 = smov 4  }
   0xc   :  { %41 = dma.hbm_to_vmem [thread:$0]  %s758_s3, 1024, %s36_s25, [#allocation5], %s656_s29, %s656_s29, %s657_s30  }
   0xd   :  { %s618_s10 = scalar_lea.vmem %s22_s27, 1024  ;;  %p623_p6 = scmp.lt.s32.totalorder %s22_s27, %s22_s27 }
   0xe   :  { %p619_p5 = scmp.ne.s32.totalorder %s22_s27, %s618_s10  ;;  %p624_p7 = scmp.lt.s32.totalorder %s618_s10, %s618_s10 }
  0x10   :  { %p625_p8 = por %p624_p7, %p623_p6 }
  0x12   :  { %p626_p9 = pnand %p625_p8, %p619_p5 }
  0x14   :  { %629 = shalt.err (!%p626_p9)
}
  0x15   :  { %27 = dma.hbm_to_vmem [thread:$0]  %s756_s1, 1024, %s22_s27, [#allocation3], %s656_s29, %s656_s29, %s657_s30  }
  0x16   :  { %s658_s13 = smov [#allocation6]  }
  0x17   :  { %s49_s14 = sshll.u32 %s658_s13, 4  ;;  %s50_s14 = int_to_ptr.vmem [resolvable:$true] %s49_s14 }
  0x18   :  { %s638_s15 = scalar_lea.vmem %s50_s14, 1024  ;;  %p643_p11 = scmp.lt.s32.totalorder %s50_s14, %s50_s14 }
  0x19   :  { %p639_p10 = scmp.ne.s32.totalorder %s50_s14, %s638_s15  ;;  %p644_p12 = scmp.lt.s32.totalorder %s638_s15, %s638_s15 }
  0x1b   :  { %p645_p13 = por %p644_p12, %p643_p11 }
  0x1d   :  { %p646_p0 = pnand %p645_p13, %p639_p10 }
  0x1f   :  { %649 = shalt.err (!%p646_p0)
}
  0x20   :  { %55 = dma.hbm_to_vmem [thread:$0]  %s760_s5, 1024, %s50_s14, [#allocation5], %s656_s29, %s656_s29, %s657_s30  }
  0x21   :  { %650 = dma.done.wait [#allocation3], 1024  }
  0x22   :  { %651 = vsyncadd [#allocation3], 4294966272 }
  0x23   :  { %652 = dma.done.wait [#allocation5], 2048  }
  0x24   :  { %653 = vsyncadd [#allocation5], 4294965248  ;;  %v659_v0 = vmov 0.0   ;;  %vm660_vm0 = vmmov 0   ;;  %v565_v1 = vld [vmem:[#allocation2 + $0x38] sm:$0xff]   ;;  %v566_v2 = vld [vmem:[#allocation2 + $0x30] sm:$0xff]  }
  0x25   :  { %498 = vmatprep.subr.bf16.mxu0 %v659_v0  ;;  %514 = vmatprep.mubr.msk.bf16.mxu0 %vm660_vm0, %v659_v0  ;;  %v567_v3 = vld [vmem:[#allocation2 + $0x28] sm:$0xff]   ;;  %v574_v4 = vld [vmem:[#allocation4 + $0x38] sm:$0xff]   ;;  %v568_v5 = vld [vmem:[#allocation2 + $0x20] sm:$0xff]  }
  0x26   :  { %518 = vmatprep.subr.bf16.mxu1 %v659_v0  ;;  %534 = vmatprep.mubr.msk.bf16.mxu1 %vm660_vm0, %v659_v0  ;;  %v575_v6 = vld [vmem:[#allocation4 + $0x30] sm:$0xff]   ;;  %v569_v7 = vld [vmem:[#allocation2 + $0x18] sm:$0xff]   ;;  %v576_v8 = vld [vmem:[#allocation4 + $0x28] sm:$0xff]  }
  0x27   :  { %499 = vmatpush3.bf16.msra.mxu0 %v565_v1  ;;  %519 = vmatpush3.bf16.msra.mxu1 %v574_v4  ;;  %v570_v9 = vld [vmem:[#allocation2 + $0x10] sm:$0xff]   ;;  %v577_v10 = vld [vmem:[#allocation4 + $0x20] sm:$0xff]   ;;  %v571_v11 = vld [vmem:[#allocation2 + $0x8] sm:$0xff]  }
  0x28   :  { %500 = vmatprep.subr.bf16.mxu0 %v659_v0  ;;  %520 = vmatprep.subr.bf16.mxu1 %v659_v0  ;;  %v578_v12 = vld [vmem:[#allocation4 + $0x18] sm:$0xff]   ;;  %v572_v13 = vld [vmem:[#allocation2] sm:$0xff]   ;;  %v579_v15 = vld [vmem:[#allocation4 + $0x10] sm:$0xff]  }
  0x29   :  { %v573_v14 = vld [vmem:[%s755_s0] sm:$0xff]   ;;  %v580_v16 = vld [vmem:[#allocation4 + $0x8] sm:$0xff]   ;;  %v582_v18 = vld [vmem:[#allocation6 + $0x38] sm:$0xff]  }
  0x2a   :  { %v581_v17 = vld [vmem:[#allocation4] sm:$0xff]   ;;  %v583_v19 = vld [vmem:[#allocation6 + $0x30] sm:$0xff]   ;;  %v584_v20 = vld [vmem:[#allocation6 + $0x28] sm:$0xff]  }
  0x2b   :  { %501 = vmatpush3.bf16.msra.mxu0 %v566_v2  ;;  %521 = vmatpush3.bf16.msra.mxu1 %v575_v6  ;;  %v585_v21 = vld [vmem:[#allocation6 + $0x20] sm:$0xff]   ;;  %v586_v22 = vld [vmem:[#allocation6 + $0x18] sm:$0xff]   ;;  %v587_v33 = vld [vmem:[#allocation6 + $0x10] sm:$0xff]  }
  0x2c   :  { %502 = vmatprep.subr.bf16.mxu0 %v659_v0  ;;  %522 = vmatprep.subr.bf16.mxu1 %v659_v0  ;;  %v434_v23 = vld [vmem:[%s757_s2] ss:$0 sm:$0xff]  ;;  %v588_v34 = vld [vmem:[#allocation6 + $0x8] sm:$0xff]  }
  0x2d   :  { %v589_v35 = vld [vmem:[#allocation6] sm:$0xff]  }
  0x2e   :  { %v444_v36 = vld [vmem:[%s759_s4] ss:$0 sm:$0xff] }
  0x2f   :  { %503 = vmatpush3.bf16.msra.mxu0 %v567_v3  ;;  %523 = vmatpush3.bf16.msra.mxu1 %v576_v8  ;;  %v453_v47 = vld [vmem:[%s761_s6] ss:$0 sm:$0xff] }
  0x30   :  { %504 = vmatprep.subr.bf16.mxu0 %v659_v0  ;;  %524 = vmatprep.subr.bf16.mxu1 %v659_v0 }
  0x33   :  { %505 = vmatpush3.bf16.msra.mxu0 %v568_v5  ;;  %525 = vmatpush3.bf16.msra.mxu1 %v577_v10 }
  0x34   :  { %506 = vmatprep.subr.bf16.mxu0 %v659_v0  ;;  %526 = vmatprep.subr.bf16.mxu1 %v659_v0 }
  0x37   :  { %507 = vmatpush3.bf16.msra.mxu0 %v569_v7  ;;  %527 = vmatpush3.bf16.msra.mxu1 %v578_v12 }
  0x38   :  { %508 = vmatprep.subr.bf16.mxu0 %v659_v0  ;;  %528 = vmatprep.subr.bf16.mxu1 %v659_v0 }
  0x3b   :  { %509 = vmatpush3.bf16.msra.mxu0 %v570_v9  ;;  %529 = vmatpush3.bf16.msra.mxu1 %v579_v15 }
  0x3c   :  { %510 = vmatprep.subr.bf16.mxu0 %v659_v0  ;;  %530 = vmatprep.subr.bf16.mxu1 %v659_v0 }
  0x3f   :  { %511 = vmatpush3.bf16.msra.mxu0 %v571_v11  ;;  %531 = vmatpush3.bf16.msra.mxu1 %v580_v16 }
  0x40   :  { %512 = vmatprep.subr.bf16.mxu0 %v659_v0  ;;  %532 = vmatprep.subr.bf16.mxu1 %v659_v0 }
  0x43   :  { %513 = vmatpush3.bf16.msra.mxu0 %v572_v13  ;;  %533 = vmatpush3.bf16.msra.mxu1 %v581_v17 }
  0x44   :  { %538 = vmatprep.subr.bf16.mxu0 %v659_v0 }
  0x46   :  { %515 = vmatmul.mubr.bf16.vlgmr.msra.gmra.mxu0 %v573_v14 }
  0x47   :  { %554 = vmatprep.mubr.msk.bf16.mxu0 %vm660_vm0, %v659_v0  ;;  %539 = vmatpush3.bf16.msra.mxu0 %v582_v18 }
  0x48   :  { %540 = vmatprep.subr.bf16.mxu0 %v659_v0 }
  0x4b   :  { %541 = vmatpush3.bf16.msra.mxu0 %v583_v19 }
  0x4c   :  { %542 = vmatprep.subr.bf16.mxu0 %v659_v0 }
  0x4f   :  { %543 = vmatpush3.bf16.msra.mxu0 %v584_v20 }
  0x50   :  { %544 = vmatprep.subr.bf16.mxu0 %v659_v0 }
  0x53   :  { %545 = vmatpush3.bf16.msra.mxu0 %v585_v21 }
  0x54   :  { %546 = vmatprep.subr.bf16.mxu0 %v659_v0 }
  0x57   :  { %547 = vmatpush3.bf16.msra.mxu0 %v586_v22 }
  0x58   :  { %548 = vmatprep.subr.bf16.mxu0 %v659_v0 }
  0x5b   :  { %549 = vmatpush3.bf16.msra.mxu0 %v587_v33 }
  0x5c   :  { %550 = vmatprep.subr.bf16.mxu0 %v659_v0 }
  0x5f   :  { %551 = vmatpush3.bf16.msra.mxu0 %v588_v34 }
  0x60   :  { %552 = vmatprep.subr.bf16.mxu0 %v659_v0 }
  0x63   :  { %553 = vmatpush3.bf16.msra.mxu0 %v589_v35 }
 0x106   :  { %v181_v24 = vpop.f32.mrf.mxu0 }
 0x107   :  { %v182_v26 = vadd.f32 %v434_v23, %v181_v24 }
 0x108   :  { %v516_v25 = vpop.f32.mrf.mxu0 }
 0x109   :  { %v188_v30 = vmax.f32 %v182_v26, 0.0 }
 0x10a   :  { %v184_v27 = vpop.f32.mrf.mxu0 }
 0x10b   :  { %v185_v28 = vadd.f32 %v434_v23, %v184_v27 }
 0x10c   :  { %v517_v29 = vpop.f32.mrf.mxu0 }
 0x10d   :  { %v189_v31 = vmax.f32 %v185_v28, 0.0 }
 0x10f   :  { %v190_v32 = vpack.c.bf16 %v189_v31, %v188_v30 }
 0x111   :  { %535 = vmatmul.mubr.bf16.vlgmr.msra.gmra.mxu1 %v190_v32 }
 0x1d1   :  { %v296_v37 = vpop.f32.mrf.mxu1 }
 0x1d2   :  { %v297_v39 = vadd.f32 %v444_v36, %v296_v37 }
 0x1d3   :  { %v536_v38 = vpop.f32.mrf.mxu1 }
 0x1d4   :  { %v303_v43 = vmax.f32 %v297_v39, 0.0 }
 0x1d5   :  { %v299_v40 = vpop.f32.mrf.mxu1 }
 0x1d6   :  { %v300_v41 = vadd.f32 %v444_v36, %v299_v40 }
 0x1d7   :  { %v537_v42 = vpop.f32.mrf.mxu1 }
 0x1d8   :  { %v304_v44 = vmax.f32 %v300_v41, 0.0 }
 0x1da   :  { %v305_v45 = vpack.c.bf16 %v304_v44, %v303_v43 }
 0x1dc   :  { %555 = vmatmul.mubr.bf16.vlgmr.msra.gmra.mxu0 %v305_v45 }
 0x29c   :  { %v411_v46 = vpop.f32.mrf.mxu0 }
 0x29d   :  { %v412_v50 = vadd.f32 %v453_v47, %v411_v46 }
 0x29e   :  { %v556_v48 = vpop.f32.mrf.mxu0 }
 0x2a0   :  { %v414_v49 = vpop.f32.mrf.mxu0 }
 0x2a1   :  { %v415_v51 = vadd.f32 %v453_v47, %v414_v49 }
 0x2a2   :  { %v557_v52 = vpop.f32.mrf.mxu0 }
 0x2a3   :  { %v469_v53 = vpack.c.bf16 %v415_v51, %v412_v50 }
 0x2a5   :  { %470 = vst [vmem:[%s762_s7] sm:$0xff] %v469_v53  }
 0x2a6   :  { %432 = vsyncpa [#allocation3], 1 }
 0x2a7   :  { %433 = vsyncpa [#allocation5], 1 }

</bundles_post_ra>
